<compile_context>
chip_gen: v7x
topology: tpu7x:2x2x1
jax: 0.10.0
libtpu: 0.0.40
codegen_flags: <defaults>
</compile_context>

<pallas_src>
import functools

import jax
import jax.numpy as jnp
from jax.experimental import pallas as pl
from jax.experimental.pallas import tpu as pltpu

# Categorical column cardinalities from the NYC taxi dataset:
# Hour -> 24, AMorPM -> 2, Weekday -> 7
CAT_SIZES = [24, 2, 7]
EMB_SZS = [(s, min(50, (s + 1) // 2)) for s in CAT_SIZES]   # [(24,12),(2,1),(7,4)]
N_EMB = sum(nf for _, nf in EMB_SZS)                        # 17
N_CONT = 6
LAYERS = [200, 100]
OUT_SZ = 1
BN_EPS = 1e-5

CAT_OFFSETS = [0]
for _s in CAT_SIZES[:-1]:
    CAT_OFFSETS.append(CAT_OFFSETS[-1] + _s)                # [0, 24, 26]
K_EMB = sum(CAT_SIZES)                                      # 33
K_EMB_PAD = 40        # sublane-aligned fused-table rows
H1_PAD = 256          # 200 -> 256 (MXU tile friendly)
H2_PAD = 128          # 100 -> 128


def _round_up(x, m):
    return ((x + m - 1) // m) * m


def _fold_bn(gamma, beta, mean, var, eps=BN_EPS):
    scale = gamma / jnp.sqrt(var + eps)
    shift = beta - mean * scale
    return scale, shift


def _mlp_kernel(x_cat_ref, x_cont_ref, t_ref, w1c_ref, b1_ref,
                w2_ref, b2_ref, w3_ref, b3_ref, out_ref):
    """One batch tile: fused embedding one-hot matmul + 2x(Linear,ReLU) + head.

    All BatchNorm affines are pre-folded into the weights/biases; dropout is
    identity (eval). Matmul operands are bf16, accumulation is f32.
    """
    tb = x_cat_ref.shape[0]
    cat = x_cat_ref[...]                                     # (tb, 3) int32

    # Embedding gather == one-hot over the concatenated categorical vocab.
    iota = jax.lax.broadcasted_iota(jnp.int32, (tb, K_EMB_PAD), 1)
    onehot = None
    for c, off in enumerate(CAT_OFFSETS):
        hit = iota == (cat[:, c:c + 1] + off)
        onehot = hit if onehot is None else (onehot | hit)
    onehot = onehot.astype(jnp.bfloat16)                     # (tb, 40)

    # Layer 1: Linear(23->200) with bn_cont folded in; embedding rows are
    # already multiplied into t_ref, so this is two small matmuls + bias.
    h = jnp.dot(onehot, t_ref[...], preferred_element_type=jnp.float32)
    h = h + jnp.dot(x_cont_ref[...], w1c_ref[...],
                    preferred_element_type=jnp.float32)
    h = jnp.maximum(h + b1_ref[...], 0.0)                    # (tb, 256) f32

    # Layer 2: Linear(200->100) with BN1 folded into W2/b2.
    h = jnp.dot(h.astype(jnp.bfloat16), w2_ref[...],
                preferred_element_type=jnp.float32)
    h = jnp.maximum(h + b2_ref[...], 0.0)                    # (tb, 128) f32

    # Head: Linear(100->1) with BN2 folded into W3/b3.
    out_ref[...] = (jnp.dot(h.astype(jnp.bfloat16), w3_ref[...],
                            preferred_element_type=jnp.float32)
                    + b3_ref[...])


def init_params(key):
    """Deterministic parameter init mirroring the shapes from __init__."""
    ks = jax.random.split(key, 16)
    p = {}
    p["emb"] = [jax.random.normal(ks[i], (ni, nf), jnp.float32) * 0.1
                for i, (ni, nf) in enumerate(EMB_SZS)]
    # bn_cont: gamma=1, beta=0, deterministic running stats
    p["bn_cont"] = (jnp.ones((N_CONT,), jnp.float32),
                    jnp.zeros((N_CONT,), jnp.float32),
                    0.1 * jax.random.normal(ks[3], (N_CONT,), jnp.float32),
                    jnp.ones((N_CONT,), jnp.float32)
                    + 0.1 * jnp.abs(jax.random.normal(ks[4], (N_CONT,), jnp.float32)))
    dims = [N_EMB + N_CONT] + LAYERS  # [23, 200, 100]
    p["lin"], p["bn"] = [], []
    for li in range(len(LAYERS)):
        fan_in, fan_out = dims[li], dims[li + 1]
        w = jax.random.normal(ks[5 + 2 * li], (fan_in, fan_out), jnp.float32) \
            * (1.0 / jnp.sqrt(fan_in))
        b = 0.01 * jax.random.normal(ks[6 + 2 * li], (fan_out,), jnp.float32)
        p["lin"].append((w, b))
        p["bn"].append((jnp.ones((fan_out,), jnp.float32),
                        jnp.zeros((fan_out,), jnp.float32),
                        0.05 * jax.random.normal(ks[9 + li], (fan_out,), jnp.float32),
                        jnp.ones((fan_out,), jnp.float32)))
    w3 = jax.random.normal(ks[12], (LAYERS[-1], OUT_SZ), jnp.float32) \
        * (1.0 / jnp.sqrt(LAYERS[-1]))
    b3 = 0.01 * jax.random.normal(ks[13], (OUT_SZ,), jnp.float32)
    p["head"] = (w3, b3)
    return p


def _prepare_operands(params):
    """Fold every BN affine into the next Linear, fuse embeddings into layer 1,
    pad to MXU-friendly shapes, cast matmul operands to bf16 (biases stay f32)."""
    cs, ch = _fold_bn(*params["bn_cont"])
    (w1, b1), (w2, b2) = params["lin"]
    s1, h1 = _fold_bn(*params["bn"][0])
    s2, h2 = _fold_bn(*params["bn"][1])
    w3, b3 = params["head"]

    w1_emb, w1_cont = w1[:N_EMB], w1[N_EMB:]                 # (17,200), (6,200)

    # Fused embedding->hidden tables: T[v] = emb_i[v] @ W1[rows_i]
    blocks, row = [], 0
    for (ni, nf), tbl in zip(EMB_SZS, params["emb"]):
        blocks.append(tbl @ w1_emb[row:row + nf])            # (ni, 200)
        row += nf
    t_emb = jnp.concatenate(blocks, axis=0)                  # (33, 200)

    w1c = cs[:, None] * w1_cont                              # bn_cont scale folded
    b1f = b1 + ch @ w1_cont                                  # bn_cont shift folded
    w2f = s1[:, None] * w2                                   # BN1 folded into L2
    b2f = b2 + h1 @ w2
    w3f = s2[:, None] * w3                                   # BN2 folded into head
    b3f = b3 + h2 @ w3

    def pad2(a, shape):
        return jnp.zeros(shape, a.dtype).at[:a.shape[0], :a.shape[1]].set(a)

    t_emb = pad2(t_emb, (K_EMB_PAD, H1_PAD)).astype(jnp.bfloat16)
    w1c = pad2(w1c, (N_CONT, H1_PAD)).astype(jnp.bfloat16)
    w2f = pad2(w2f, (H1_PAD, H2_PAD)).astype(jnp.bfloat16)
    w3f = pad2(w3f, (H2_PAD, OUT_SZ)).astype(jnp.bfloat16)
    b1f = pad2(b1f.reshape(1, -1), (1, H1_PAD))
    b2f = pad2(b2f.reshape(1, -1), (1, H2_PAD))
    b3f = b3f.reshape(1, OUT_SZ)
    return t_emb, w1c, b1f, w2f, b2f, w3f, b3f


@functools.partial(jax.jit, static_argnames=("block_batch",))
def tabular_forward(params, x_cat, x_cont, block_batch=1024):
    """Glue (BN/weight folding, padding, casting) in JAX; MLP in the Pallas kernel."""
    B = x_cat.shape[0]
    t_emb, w1c, b1f, w2f, b2f, w3f, b3f = _prepare_operands(params)

    # Batch tile: large (per-grid-step overhead ~0.35us) but bounded so the
    # per-step activations fit far under the v7x 32 MiB scoped-VMEM default.
    tb = min(_round_up(block_batch, 8), _round_up(B, 8))
    b_pad = _round_up(B, tb)
    x_cat_p = jnp.zeros((b_pad, len(CAT_SIZES)), jnp.int32).at[:B].set(
        x_cat.astype(jnp.int32))
    x_cont_p = jnp.zeros((b_pad, N_CONT), jnp.bfloat16).at[:B].set(
        x_cont.astype(jnp.bfloat16))

    batch_spec = lambda w: pl.BlockSpec((tb, w), lambda i: (i, 0))
    const_spec = lambda s: pl.BlockSpec(s, lambda i: (0, 0))   # VMEM-resident

    flops = 2 * b_pad * (K_EMB * LAYERS[0] + N_CONT * LAYERS[0]
                         + LAYERS[0] * LAYERS[1] + LAYERS[1] * OUT_SZ)
    bytes_accessed = (b_pad * (len(CAT_SIZES) * 4 + N_CONT * 2 + OUT_SZ * 4)
                      + 2 * (K_EMB_PAD * H1_PAD + N_CONT * H1_PAD
                             + H1_PAD * H2_PAD + H2_PAD * OUT_SZ))

    out = pl.pallas_call(
        _mlp_kernel,
        out_shape=jax.ShapeDtypeStruct((b_pad, OUT_SZ), jnp.float32),
        grid=(b_pad // tb,),
        in_specs=[
            batch_spec(len(CAT_SIZES)),          # x_cat   (streamed)
            batch_spec(N_CONT),                  # x_cont  (streamed)
            const_spec((K_EMB_PAD, H1_PAD)),     # fused emb->h1 table
            const_spec((N_CONT, H1_PAD)),        # W1 cont rows (bn_cont folded)
            const_spec((1, H1_PAD)),             # b1
            const_spec((H1_PAD, H2_PAD)),        # W2 (BN1 folded)
            const_spec((1, H2_PAD)),             # b2
            const_spec((H2_PAD, OUT_SZ)),        # W3 (BN2 folded)
            const_spec((1, OUT_SZ)),             # b3
        ],
        out_specs=batch_spec(OUT_SZ),
        compiler_params=pltpu.CompilerParams(
            dimension_semantics=("parallel",)),   # megacore on v7x
        cost_estimate=pl.CostEstimate(
            flops=flops, transcendentals=0, bytes_accessed=bytes_accessed),
    )(x_cat_p, x_cont_p, t_emb, w1c, b1f, w2f, b2f, w3f, b3f)
    return out[:B]


def _reference_forward(params, x_cat, x_cont):
    """Pure-JAX f32 reference with identical (eval-mode) semantics."""
    embs = [tbl[x_cat[:, i]] for i, tbl in enumerate(params["emb"])]
    x = jnp.concatenate(embs, axis=1)
    cs, ch = _fold_bn(*params["bn_cont"])
    xc = x_cont * cs + ch
    x = jnp.concatenate([x, xc], axis=1)
    for (w, b), bn in zip(params["lin"], params["bn"]):
        x = jnp.maximum(x @ w + b, 0.0)
        s, h = _fold_bn(*bn)
        x = x * s + h
    w3, b3 = params["head"]
    return x @ w3 + b3


if __name__ == "__main__":
    B = 200   # small; deliberately not a multiple of the batch tile
    key = jax.random.PRNGKey(0)
    k_cat, k_cont = jax.random.split(key)
    ks = jax.random.split(k_cat, len(CAT_SIZES))
    x_cat = jnp.stack(
        [jax.random.randint(ks[i], (B,), 0, CAT_SIZES[i], dtype=jnp.int32)
         for i in range(len(CAT_SIZES))], axis=1)                     # (B, 3) int32
    x_cont = jax.random.normal(k_cont, (B, N_CONT), jnp.float32)      # (B, 6) f32

    params = init_params(jax.random.PRNGKey(42))

    out = tabular_forward(params, x_cat, x_cont, block_batch=128)     # grid of 2
    out = jax.block_until_ready(out)

    ref = _reference_forward(params, x_cat, x_cont)
    assert out.shape == (B, OUT_SZ)
    err = float(jnp.max(jnp.abs(out - ref)))
    # bf16 matmul operands with f32 accumulation -> allow bf16-level error.
    assert err < 5e-2, f"mismatch vs reference: max abs err {err}"

    print("KERNEL_OK")
</pallas_src>

<mosaic_0001>
module attributes {stable_mosaic.version = 11 : i64} {
  func.func @_mlp_kernel(%arg0: i32, %arg1: memref<128x3xi32, #tpu.memory_space<vmem>>, %arg2: memref<128x6xbf16, #tpu.memory_space<vmem>>, %arg3: memref<40x256xbf16, #tpu.memory_space<vmem>>, %arg4: memref<6x256xbf16, #tpu.memory_space<vmem>>, %arg5: memref<1x256xf32, #tpu.memory_space<vmem>>, %arg6: memref<256x128xbf16, #tpu.memory_space<vmem>>, %arg7: memref<1x128xf32, #tpu.memory_space<vmem>>, %arg8: memref<128x1xbf16, #tpu.memory_space<vmem>>, %arg9: memref<1x1xf32, #tpu.memory_space<vmem>>, %arg10: memref<128x1xf32, #tpu.memory_space<vmem>>) attributes {dimension_semantics = [#tpu.dimension_semantics<parallel>], iteration_bounds = array<i64: 2>, scalar_prefetch = 0 : i64, scratch_operands = 0 : i64, tpu.core_type = #tpu.core_type<tc>, window_params = [{transform_indices = @transform_0, window_bounds = array<i64: 128, 3>}, {transform_indices = @transform_1, window_bounds = array<i64: 128, 6>}, {pipeline_mode = #tpu.pipeline_mode<synchronous>, transform_indices = @transform_2, window_bounds = array<i64: 40, 256>}, {pipeline_mode = #tpu.pipeline_mode<synchronous>, transform_indices = @transform_3, window_bounds = array<i64: 6, 256>}, {pipeline_mode = #tpu.pipeline_mode<synchronous>, transform_indices = @transform_4, window_bounds = array<i64: 1, 256>}, {pipeline_mode = #tpu.pipeline_mode<synchronous>, transform_indices = @transform_5, window_bounds = array<i64: 256, 128>}, {pipeline_mode = #tpu.pipeline_mode<synchronous>, transform_indices = @transform_6, window_bounds = array<i64: 1, 128>}, {pipeline_mode = #tpu.pipeline_mode<synchronous>, transform_indices = @transform_7, window_bounds = array<i64: 128, 1>}, {pipeline_mode = #tpu.pipeline_mode<synchronous>, transform_indices = @transform_8, window_bounds = array<i64: 1, 1>}, {transform_indices = @transform_9, window_bounds = array<i64: 128, 1>}]} {
    %c0 = arith.constant 0 : index
    %c0_0 = arith.constant 0 : index
    %0 = vector.load %arg1[%c0, %c0_0] : memref<128x3xi32, #tpu.memory_space<vmem>>, vector<128x3xi32>
    %1 = tpu.iota {dimensions = array<i32: 1>} : vector<128x40xi32>
    %2 = vector.extract_strided_slice %0 {offsets = [0, 0], sizes = [128, 1], strides = [1, 1]} : vector<128x3xi32> to vector<128x1xi32>
    %c0_i32 = arith.constant 0 : i32
    %3 = vector.broadcast %c0_i32 : i32 to vector<128x1xi32>
    %4 = arith.addi %2, %3 : vector<128x1xi32>
    %5 = vector.broadcast %4 : vector<128x1xi32> to vector<128x40xi32>
    %6 = arith.cmpi eq, %1, %5 : vector<128x40xi32>
    %7 = vector.extract_strided_slice %0 {offsets = [0, 1], sizes = [128, 1], strides = [1, 1]} : vector<128x3xi32> to vector<128x1xi32>
    %c24_i32 = arith.constant 24 : i32
    %8 = vector.broadcast %c24_i32 : i32 to vector<128x1xi32>
    %9 = arith.addi %7, %8 : vector<128x1xi32>
    %10 = vector.broadcast %9 : vector<128x1xi32> to vector<128x40xi32>
    %11 = arith.cmpi eq, %1, %10 : vector<128x40xi32>
    %12 = arith.ori %6, %11 : vector<128x40xi1>
    %13 = vector.extract_strided_slice %0 {offsets = [0, 2], sizes = [128, 1], strides = [1, 1]} : vector<128x3xi32> to vector<128x1xi32>
    %c26_i32 = arith.constant 26 : i32
    %14 = vector.broadcast %c26_i32 : i32 to vector<128x1xi32>
    %15 = arith.addi %13, %14 : vector<128x1xi32>
    %16 = vector.broadcast %15 : vector<128x1xi32> to vector<128x40xi32>
    %17 = arith.cmpi eq, %1, %16 : vector<128x40xi32>
    %18 = arith.ori %12, %17 : vector<128x40xi1>
    %19 = arith.extui %18 : vector<128x40xi1> to vector<128x40xi32>
    %20 = arith.sitofp %19 : vector<128x40xi32> to vector<128x40xf32>
    %21 = arith.truncf %20 : vector<128x40xf32> to vector<128x40xbf16>
    %c0_1 = arith.constant 0 : index
    %c0_2 = arith.constant 0 : index
    %22 = vector.load %arg3[%c0_1, %c0_2] : memref<40x256xbf16, #tpu.memory_space<vmem>>, vector<40x256xbf16>
    %cst = arith.constant dense<0.000000e+00> : vector<128x256xf32>
    %23 = tpu.matmul %21, %22, %cst {dimension_numbers = #tpu.dot_dimension_numbers<[1], [0], [0], [1], [0, 0, 1, 1], [], []>} : vector<128x40xbf16>, vector<40x256xbf16>, vector<128x256xf32> -> vector<128x256xf32>
    %c0_3 = arith.constant 0 : index
    %c0_4 = arith.constant 0 : index
    %24 = vector.load %arg2[%c0_3, %c0_4] : memref<128x6xbf16, #tpu.memory_space<vmem>>, vector<128x6xbf16>
    %c0_5 = arith.constant 0 : index
    %c0_6 = arith.constant 0 : index
    %25 = vector.load %arg4[%c0_5, %c0_6] : memref<6x256xbf16, #tpu.memory_space<vmem>>, vector<6x256xbf16>
    %cst_7 = arith.constant dense<0.000000e+00> : vector<128x256xf32>
    %26 = tpu.matmul %24, %25, %cst_7 {dimension_numbers = #tpu.dot_dimension_numbers<[1], [0], [0], [1], [0, 0, 1, 1], [], []>} : vector<128x6xbf16>, vector<6x256xbf16>, vector<128x256xf32> -> vector<128x256xf32>
    %27 = arith.addf %23, %26 : vector<128x256xf32>
    %c0_8 = arith.constant 0 : index
    %c0_9 = arith.constant 0 : index
    %28 = vector.load %arg5[%c0_8, %c0_9] : memref<1x256xf32, #tpu.memory_space<vmem>>, vector<1x256xf32>
    %29 = vector.broadcast %28 : vector<1x256xf32> to vector<128x256xf32>
    %30 = arith.addf %27, %29 : vector<128x256xf32>
    %cst_10 = arith.constant 0.000000e+00 : f32
    %31 = vector.broadcast %cst_10 : f32 to vector<128x256xf32>
    %32 = arith.maximumf %30, %31 : vector<128x256xf32>
    %33 = arith.truncf %32 : vector<128x256xf32> to vector<128x256xbf16>
    %c0_11 = arith.constant 0 : index
    %c0_12 = arith.constant 0 : index
    %34 = vector.load %arg6[%c0_11, %c0_12] : memref<256x128xbf16, #tpu.memory_space<vmem>>, vector<256x128xbf16>
    %cst_13 = arith.constant dense<0.000000e+00> : vector<128x128xf32>
    %35 = tpu.matmul %33, %34, %cst_13 {dimension_numbers = #tpu.dot_dimension_numbers<[1], [0], [0], [1], [0, 0, 1, 1], [], []>} : vector<128x256xbf16>, vector<256x128xbf16>, vector<128x128xf32> -> vector<128x128xf32>
    %c0_14 = arith.constant 0 : index
    %c0_15 = arith.constant 0 : index
    %36 = vector.load %arg7[%c0_14, %c0_15] : memref<1x128xf32, #tpu.memory_space<vmem>>, vector<1x128xf32>
    %37 = vector.broadcast %36 : vector<1x128xf32> to vector<128x128xf32>
    %38 = arith.addf %35, %37 : vector<128x128xf32>
    %cst_16 = arith.constant 0.000000e+00 : f32
    %39 = vector.broadcast %cst_16 : f32 to vector<128x128xf32>
    %40 = arith.maximumf %38, %39 : vector<128x128xf32>
    %41 = arith.truncf %40 : vector<128x128xf32> to vector<128x128xbf16>
    %c0_17 = arith.constant 0 : index
    %c0_18 = arith.constant 0 : index
    %42 = vector.load %arg8[%c0_17, %c0_18] : memref<128x1xbf16, #tpu.memory_space<vmem>>, vector<128x1xbf16>
    %cst_19 = arith.constant dense<0.000000e+00> : vector<128x1xf32>
    %43 = tpu.matmul %41, %42, %cst_19 {dimension_numbers = #tpu.dot_dimension_numbers<[1], [0], [0], [1], [0, 0, 1, 1], [], []>} : vector<128x128xbf16>, vector<128x1xbf16>, vector<128x1xf32> -> vector<128x1xf32>
    %c0_20 = arith.constant 0 : index
    %c0_21 = arith.constant 0 : index
    %44 = vector.load %arg9[%c0_20, %c0_21] : memref<1x1xf32, #tpu.memory_space<vmem>>, vector<1x1xf32>
    %45 = vector.broadcast %44 : vector<1x1xf32> to vector<128x1xf32>
    %46 = arith.addf %43, %45 : vector<128x1xf32>
    %c0_22 = arith.constant 0 : index
    %c0_23 = arith.constant 0 : index
    %47 = vector.load %arg10[%c0_22, %c0_23] : memref<128x1xf32, #tpu.memory_space<vmem>>, vector<128x1xf32>
    tpu.vector_store %arg10[%c0_22, %c0_23], %46 {strides = array<i32>} : memref<128x1xf32, #tpu.memory_space<vmem>>, vector<128x1xf32>,
    return
  }
  func.func @transform_0(%arg0: i32) -> (i32, i32) {
    %c0_i32 = arith.constant 0 : i32
    %c0_i32_0 = arith.constant 0 : i32
    return %arg0, %c0_i32 : i32, i32
  }
  func.func @transform_1(%arg0: i32) -> (i32, i32) {
    %c0_i32 = arith.constant 0 : i32
    %c0_i32_0 = arith.constant 0 : i32
    return %arg0, %c0_i32 : i32, i32
  }
  func.func @transform_2(%arg0: i32) -> (i32, i32) {
    %c0_i32 = arith.constant 0 : i32
    %c0_i32_0 = arith.constant 0 : i32
    %c0_i32_1 = arith.constant 0 : i32
    return %c0_i32, %c0_i32_0 : i32, i32
  }
  func.func @transform_3(%arg0: i32) -> (i32, i32) {
    %c0_i32 = arith.constant 0 : i32
    %c0_i32_0 = arith.constant 0 : i32
    %c0_i32_1 = arith.constant 0 : i32
    return %c0_i32, %c0_i32_0 : i32, i32
  }
  func.func @transform_4(%arg0: i32) -> (i32, i32) {
    %c0_i32 = arith.constant 0 : i32
    %c0_i32_0 = arith.constant 0 : i32
    %c0_i32_1 = arith.constant 0 : i32
    return %c0_i32, %c0_i32_0 : i32, i32
  }
  func.func @transform_5(%arg0: i32) -> (i32, i32) {
    %c0_i32 = arith.constant 0 : i32
    %c0_i32_0 = arith.constant 0 : i32
    %c0_i32_1 = arith.constant 0 : i32
    return %c0_i32, %c0_i32_0 : i32, i32
  }
  func.func @transform_6(%arg0: i32) -> (i32, i32) {
    %c0_i32 = arith.constant 0 : i32
    %c0_i32_0 = arith.constant 0 : i32
    %c0_i32_1 = arith.constant 0 : i32
    return %c0_i32, %c0_i32_0 : i32, i32
  }
  func.func @transform_7(%arg0: i32) -> (i32, i32) {
    %c0_i32 = arith.constant 0 : i32
    %c0_i32_0 = arith.constant 0 : i32
    %c0_i32_1 = arith.constant 0 : i32
    return %c0_i32, %c0_i32_0 : i32, i32
  }
  func.func @transform_8(%arg0: i32) -> (i32, i32) {
    %c0_i32 = arith.constant 0 : i32
    %c0_i32_0 = arith.constant 0 : i32
    %c0_i32_1 = arith.constant 0 : i32
    return %c0_i32, %c0_i32_0 : i32, i32
  }
  func.func @transform_9(%arg0: i32) -> (i32, i32) {
    %c0_i32 = arith.constant 0 : i32
    %c0_i32_0 = arith.constant 0 : i32
    return %arg0, %c0_i32 : i32, i32
  }
}

</mosaic_0001>

<bundles_post_ra>
// kernel: tabular_forward.1
= control target key start
LH: loop header
LB: loop body
LE: loop exit
PB: predicated region body
PF: predicated region fallthrough
CT: control target
= control target key end

     0   :  { %s2038_s11 = smov 0   ;;  %s2419_s0 = inlined_call_operand.vmem [shape: s32[256,3], index: 0, kind: input, shape index: {}]   ;;  %s2420_s1 = inlined_call_operand.vmem [shape: bf16[256,6], index: 1, kind: input, shape index: {}]   ;;  %s2421_s2 = inlined_call_operand.vmem [shape: bf16[40,256], index: 2, kind: input, shape index: {}]   ;;  %s2422_s3 = inlined_call_operand.vmem [shape: bf16[6,256], index: 3, kind: input, shape index: {}]   ;;  %s2423_s4 = inlined_call_operand.vmem [shape: f32[1,256], index: 4, kind: input, shape index: {}]   ;;  %s2424_s5 = inlined_call_operand.vmem [shape: bf16[256,128], index: 5, kind: input, shape index: {}]   ;;  %s2425_s6 = inlined_call_operand.vmem [shape: f32[1,128], index: 6, kind: input, shape index: {}]   ;;  %s2426_s7 = inlined_call_operand.vmem [shape: bf16[128,1], index: 7, kind: input, shape index: {}]   ;;  %s2427_s8 = inlined_call_operand.<no memory space> [shape: f32[1,1], index: 8, kind: input, shape index: {}]   ;;  %s2428_s9 = inlined_call_operand.vmem [shape: f32[256,1], index: 9, kind: output, shape index: {}]  }
   0x1   :  { %v14_v0 = vstv %s2427_s8 }
   0x2   :  { %15 = vst [vmem:[#allocation2] sm:$0x1] %v14_v0 }
   0x3 LB: > { %s1658_s12 = sadd.s32 4294967295, %s1979_s11   ;;  %p1662_p0 = scmp.ge.s32.totalorder %s1979_s11, 1  ;;  %s1979_s11 = sphi %s2038_s11, %s21_s11  }
   0x4   : > { %p301_p1 = scmp.lt.s32.totalorder %s1979_s11, 3 }
   0x6   : > { %p302_p2 = pnand %p1662_p0, %p301_p1 }
   0x7   : > { %s1663_s13 = sshll.u32 (!%p302_p2), %s1658_s12, 4  ;;  %v696_v1 = vld [vmem:[%s2422_s3] sm:$0x77] (!%p302_p2)  ;;  %v1981_v2 = vmov (!%p302_p2), 2   ;;  %v1982_v3 = vmov (!%p302_p2), 1   ;;  %vm767_vm0 = vcmask (!%p302_p2), 1042432  }
   0x8   : > { %305 = sbr.rel (%p302_p2) target bundleno = 959 (0x3bf), region = 56  ;;  %1904 = vset.pattern.permute.xlu0 (!%p302_p2), %v1981_v2  ;;  %1903 = vset.pattern.permute.xlu1 (!%p302_p2), %v1982_v3  ;;  %p343_p3 = scmp.lt.s32.totalorder (!%p302_p2), %s1663_s13, 31  ;;  %v1694_v4 = vcombine.high (!%p302_p2), %v696_v1, %v696_v1  ;;  %v1693_v5 = vcombine.low (!%p302_p2), %v696_v1, %v696_v1  ;;  %v1983_v6 = vmov (!%p302_p2), 0   ;;  %vm742_vm1 = vcmask (!%p302_p2), 48128   ;;  %v1940_v20 = vld [vmem:[%s2421_s2] ss:$8 sps:$4 sm:$0xff] (!%p302_p2)  }
   0x9   : > { %806 = vmatprep.mubr.bf16.mxu0 (!%p302_p2), %v1983_v6  ;;  %v1942_v21 = vld [vmem:[%s2421_s2 + $0x4] ss:$8 sps:$4 sm:$0xff] (!%p302_p2)   ;;  %v1946_v23 = vld [vmem:[%s2421_s2 + $0x14] ss:$8 sps:$4 sm:$0xff] (!%p302_p2)   ;;  %v1944_v25 = vld [vmem:[%s2421_s2 + $0x10] ss:$8 sps:$4 sm:$0xff] (!%p302_p2)  }
   0xa   : > { %1695 = vmatprep.subr.msk.bf16.mxu0 (!%p302_p2), %vm767_vm0, %v1694_v4  ;;  %v769_v7 = vsel (!%p302_p2), %vm767_vm0, %v1693_v5, 0  ;;  %v679_v26 = vld [vmem:[%s2421_s2 + $0x20] sm:$0xff] (!%p302_p2)  ;;  %vm937_vm2 = vcmask (!%p302_p2), 1043456   ;;  %vm912_vm13 = vcmask (!%p302_p2), 326656  }
   0xb   : > { %775 = vmatpush1.bf16.msra.mxu0 (!%p302_p2), %v769_v7  ;;  %v1709_v27 = vcombine.high (!%p302_p2), %v679_v26, %v679_v26  ;;  %v1708_v28 = vcombine.low (!%p302_p2), %v679_v26, %v679_v26  ;;  %v1951_v26 = vld [vmem:[%s2424_s5 + $0x48] sm:$0xff] (!%p302_p2)  }
   0xc   : > { %944 = vmatprep.subr.bf16.mxu0 (!%p302_p2), %v1942_v21 }
   0xd   : > { %v939_v31 = vsel (!%p302_p2), %vm937_vm2, %v1708_v28, 0 }
   0xf   : > { %s2430_s13 = smov (!%p343_p3, %s1663_s13), 31 }
  0x10   : > { %s1664_s8 = sshll.u32 %s2430_s13, 3  ;;  %s1666_s19 = sshll.u32 %s2430_s13, 2 }
  0x11   : > { %s2060_s18 = scalar_lea.vmem %s2419_s0, %s1664_s8  ;;  %s2069_s22 = scalar_lea.vmem %s2420_s1, %s1666_s19 }
  0x12   : > { %v361_v8 = vld [vmem:[%s2060_s18] sm:$0xff]  ;;  %v363_v9 = vld [vmem:[%s2060_s18 + $0x10] sm:$0xff]  ;;  %v362_v10 = vld [vmem:[%s2060_s18 + $0x8] sm:$0xff]  ;;  %s2382_s30 = scalar_lea.vmem %s2428_s9, %s1664_s8 }
  0x13   : > { %v539_v11 = vadd.s32 26, %v361_v8  ;;  %v443_v12 = vadd.s32 24, %v361_v8  ;;  %v541_v13 = vadd.s32 26, %v363_v9  ;;  %v444_v14 = vadd.s32 24, %v362_v10  ;;  %v365_v15 = vld [vmem:[%s2060_s18 + $0x20] sm:$0xff]  ;;  %v1934_v19 = vld [vmem:[%s2069_s22 + $0x8] sm:$0xff]  }
  0x14   : > { %v1933_v16 = vld [vmem:[%s2069_s22] sm:$0xff]   ;;  %v543_v17 = vadd.s32 26, %v365_v15  ;;  %v540_v18 = vadd.s32 26, %v362_v10  ;;  %v445_v22 = vadd.s32 24, %v363_v9  ;;  %v364_v24 = vld [vmem:[%s2060_s18 + $0x18] sm:$0xff]  ;;  %v1935_v29 = vld [vmem:[%s2069_s22 + $0x10] sm:$0xff]  }
  0x15   : > { %556 = vperm.xlu0 %1904, %v539_v11   ;;  %460 = vperm.xlu1 %1903, %v443_v12   ;;  %v446_v30 = vadd.s32 24, %v364_v24  ;;  %v542_v32 = vadd.s32 26, %v364_v24  ;;  %v366_v33 = vld [vmem:[%s2060_s18 + $0x28] sm:$0xff]  ;;  %v368_v34 = vld [vmem:[%s2060_s18 + $0x38] sm:$0xff]  ;;  %v447_v37 = vadd.s32 24, %v365_v15  ;;  %v1937_v39 = vld [vmem:[%s2069_s22 + $0x20] sm:$0xff]  }
  0x16   : > { %1696 = vmatmul.mubr.msk.bf16.vlgmr.msra.gmra.mrb[0].mxu0 %vm742_vm1, %v1933_v16  ;;  %v1936_v35 = vld [vmem:[%s2069_s22 + $0x18] sm:$0xff]   ;;  %v2106_v36 = vld [vmem:[%s2060_s18 + $0x48] sm:$0xff]  ;;  %v367_v40 = vld [vmem:[%s2060_s18 + $0x30] sm:$0xff]  ;;  %v448_v41 = vadd.s32 24, %v366_v33  ;;  %v544_v45 = vadd.s32 26, %v366_v33  ;;  %v450_v53 = vadd.s32 24, %v368_v34 }
  0x17   : > { %816 = vmatprep.mubr.bf16.mxu0 %v1983_v6  ;;  %945 = vmatpush1.bf16.msra.mxu0 %v1940_v20  ;;  %v2113_v38 = vld [vmem:[%s2060_s18 + $0x58] sm:$0xff]  ;;  %v545_v42 = vadd.s32 26, %v367_v40  ;;  %v369_v43 = vld [vmem:[%s2060_s18 + $0x40] sm:$0xff]  ;;  %v1938_v46 = vld [vmem:[%s2069_s22 + $0x28] sm:$0xff]   ;;  %v449_v52 = vadd.s32 24, %v367_v40  ;;  %v546_v57 = vadd.s32 26, %v368_v34 }
  0x18   : > { %946 = vmatprep.subr.bf16.mxu0 %v1946_v23  ;;  %v547_v44 = vadd.s32 26, %v369_v43  ;;  %v371_v47 = vld [vmem:[%s2060_s18 + $0x50] sm:$0xff]  ;;  %v373_v49 = vld [vmem:[%s2060_s18 + $0x60] sm:$0xff]  ;;  %v374_v54 = vld [vmem:[%s2060_s18 + $0x68] sm:$0xff]  ;;  %v451_v60 = vadd.s32 24, %v369_v43  ;;  %v452_v61 = vadd.s32 24, %v2106_v36 }
  0x19   : > { %562 = vperm.xlu0 %1904, %v541_v13   ;;  %463 = vperm.xlu1 %1903, %v444_v14   ;;  %v549_v48 = vadd.s32 26, %v371_v47  ;;  %v551_v50 = vadd.s32 26, %v373_v49  ;;  %v1939_v51 = vld [vmem:[%s2069_s22 + $0x30] sm:$0xff]   ;;  %v1943_v55 = vld [vmem:[%s2069_s22 + $0x38] sm:$0xff]   ;;  %v548_v62 = vadd.s32 26, %v2106_v36  ;;  %v453_v63 = vadd.s32 24, %v371_v47 }
  0x1a   : > { %v376_v56 = vld [vmem:[%s2060_s18 + $0x78] sm:$0xff]  ;;  %v375_v58 = vld [vmem:[%s2060_s18 + $0x70] sm:$0xff]  ;;  %v454_v0 = vadd.s32 24, %v2113_v38  ;;  %v550_v1 = vadd.s32 26, %v2113_v38  ;;  %v455_v4 = vadd.s32 24, %v373_v49  ;;  %v456_v5 = vadd.s32 24, %v374_v54 }
  0x1b   : > { %947 = vmatpush1.bf16.msra.mxu0 %v1944_v25  ;;  %v553_v59 = vadd.s32 26, %v375_v58  ;;  %v552_v7 = vadd.s32 26, %v374_v54  ;;  %v377_v13 = vlaneseq  ;;  %v458_v14 = vadd.s32 24, %v376_v56 }
  0x1c   : > { %1710 = vmatprep.subr.msk.bf16.mxu0 %vm937_vm2, %v1709_v27  ;;  %v1984_v23 = vmov 0.0  }
  0x1d   : > { %568 = vperm.xlu0 %1904, %v543_v17   ;;  %1905 = vset.pattern.permute.xlu1 %v1981_v2  ;;  %v2161_v17 = vand.u32 127, %v377_v13 }
  0x1e   : > { %559 = vperm.xlu1 %1905, %v540_v18   ;;  %1697 = vmatmul.mubr.msk.bf16.gmra.mrb[4].mxu0 %vm742_vm1, %v1934_v19  ;;  %v554_v18 = vadd.s32 26, %v376_v56 }
  0x1f   : > { %826 = vmatprep.mubr.bf16.mxu0 %v1983_v6  ;;  %949 = vmatpush1.bf16.msra.mxu0 %v939_v31  ;;  %v1953_v31 = vld [vmem:[%s2424_s5 + $0x50] sm:$0xff]  }
  0x21   : > { %1911 = vset.pattern.permute.xlu0 %v1983_v6 }
  0x22   : > { %380 = vperm.xlu0 %1911, %v361_v8   ;;  %1906 = vset.pattern.permute.xlu1 %v1983_v6 }
  0x23   : > { %386 = vperm.xlu1 %1906, %v363_v9  }
  0x26   : > { %383 = vperm.xlu0 %1911, %v362_v10   ;;  %1698 = vmatmul.mubr.msk.bf16.gmra.mrb[8].mxu0 %vm742_vm1, %v1935_v29  ;;  %v457_v10 = vadd.s32 24, %v375_v58 }
  0x27   : > { %1907 = vset.pattern.permute.xlu1 %v1982_v3  ;;  %836 = vmatprep.mubr.bf16.mxu0 %v1983_v6 }
  0x28   : > { %466 = vperm.xlu1 %1907, %v445_v22   ;;  %v1950_v22 = vld [vmem:[%s2424_s5] sm:$0xff]  }
  0x2a   : > { %389 = vperm.xlu0 %1911, %v364_v24  }
  0x2c   : > { %469 = vperm.xlu1 %1907, %v446_v30   ;;  %v1952_v30 = vld [vmem:[%s2424_s5 + $0x8] sm:$0xff]  }
  0x2e   : > { %395 = vperm.xlu0 %1911, %v366_v33   ;;  %1699 = vmatmul.mubr.msk.bf16.gmra.mrb[12].mxu0 %vm742_vm1, %v1936_v35 }
  0x2f   : > { %846 = vmatprep.mubr.bf16.mxu0 %v1983_v6 }
  0x30   : > { %1908 = vset.pattern.permute.xlu1 %v1981_v2 }
  0x31   : > { %565 = vperm.xlu1 %1908, %v542_v32   ;;  %v1954_v32 = vld [vmem:[%s2424_s5 + $0x10] sm:$0xff]  }
  0x32   : > { %401 = vperm.xlu0 %1911, %v368_v34   ;;  %v1955_v34 = vld [vmem:[%s2424_s5 + $0x58] sm:$0xff]  }
  0x35   : > { %1909 = vset.pattern.permute.xlu1 %v1983_v6 }
  0x36   : > { %392 = vperm.xlu1 %1909, %v365_v15   ;;  %407 = vperm.xlu0 %1911, %v2106_v36  }
  0x37   : > { %1700 = vmatmul.mubr.msk.bf16.gmra.mrb[16].mxu0 %vm742_vm1, %v1937_v39  ;;  %v1957_v39 = vld [vmem:[%s2424_s5 + $0x60] sm:$0xff]  }
  0x38   : > { %856 = vmatprep.mubr.bf16.mxu0 %v1983_v6 }
  0x3a   : > { %1910 = vset.pattern.permute.xlu1 %v1982_v3  ;;  %413 = vperm.xlu0 %1911, %v2113_v38  }
  0x3b   : > { %472 = vperm.xlu1 %1910, %v447_v37   ;;  %v1956_v37 = vld [vmem:[%s2424_s5 + $0x18] sm:$0xff]  }
  0x3e   : > { %1920 = vset.pattern.permute.xlu0 %v1981_v2 }
  0x3f   : > { %475 = vperm.xlu1 %1910, %v448_v41   ;;  %574 = vperm.xlu0 %1920, %v545_v42   ;;  %v1958_v41 = vld [vmem:[%s2424_s5 + $0x20] sm:$0xff]  }
  0x40   : > { %1701 = vmatmul.mubr.msk.bf16.gmra.mrb[20].mxu0 %vm742_vm1, %v1938_v46 }
  0x41   : > { %866 = vmatprep.mubr.bf16.mxu0 %v1983_v6 }
  0x43   : > { %1912 = vset.pattern.permute.xlu1 %v1981_v2  ;;  %580 = vperm.xlu0 %1920, %v547_v44  }
  0x44   : > { %571 = vperm.xlu1 %1912, %v544_v45  }
  0x47   : > { %586 = vperm.xlu0 %1920, %v549_v48  }
  0x48   : > { %1913 = vset.pattern.permute.xlu1 %v1983_v6  ;;  %1702 = vmatmul.mubr.msk.bf16.gmra.mrb[24].mxu0 %vm742_vm1, %v1939_v51 }
  0x49   : > { %398 = vperm.xlu1 %1913, %v367_v40   ;;  %876 = vmatprep.mubr.bf16.mxu0 %v1983_v6 }
  0x4b   : > { %592 = vperm.xlu0 %1920, %v551_v50  }
  0x4d   : > { %1914 = vset.pattern.permute.xlu1 %v1982_v3 }
  0x4e   : > { %478 = vperm.xlu1 %1914, %v449_v52  }
  0x4f   : > { %1925 = vset.pattern.permute.xlu0 %v1983_v6 }
  0x50   : > { %419 = vperm.xlu0 %1925, %v374_v54   ;;  %1703 = vmatmul.mubr.msk.bf16.gmra.mrb[28].mxu0 %vm742_vm1, %v1943_v55 }
  0x51   : > { %976 = vmatprep.mubr.bf16.mxu0 %v1983_v6 }
  0x52   : > { %481 = vperm.xlu1 %1914, %v450_v53  }
  0x54   : > { %425 = vperm.xlu0 %1925, %v376_v56  }
  0x56   : > { %1915 = vset.pattern.permute.xlu1 %v1981_v2 }
  0x57   : > { %577 = vperm.xlu1 %1915, %v546_v57  }
  0x58   : > { %1929 = vset.pattern.permute.xlu0 %v1981_v2 }
  0x59   : > { %598 = vperm.xlu0 %1929, %v553_v59  }
  0x5b   : > { %1916 = vset.pattern.permute.xlu1 %v1983_v6 }
  0x5c   : > { %404 = vperm.xlu1 %1916, %v369_v43   ;;  %v1959_v43 = vld [vmem:[%s2424_s5 + $0x68] sm:$0xff]  }
  0x60   : > { %1917 = vset.pattern.permute.xlu1 %v1982_v3 }
  0x61   : > { %484 = vperm.xlu1 %1917, %v451_v60  }
  0x65   : > { %487 = vperm.xlu1 %1917, %v452_v61  }
  0x69   : > { %1918 = vset.pattern.permute.xlu1 %v1981_v2 }
  0x6a   : > { %583 = vperm.xlu1 %1918, %v548_v62  }
  0x6e   : > { %1919 = vset.pattern.permute.xlu1 %v1983_v6 }
  0x6f   : > { %410 = vperm.xlu1 %1919, %v371_v47  }
  0x73   : > { %1921 = vset.pattern.permute.xlu1 %v1982_v3 }
  0x74   : > { %490 = vperm.xlu1 %1921, %v453_v63  }
  0x78   : > { %493 = vperm.xlu1 %1921, %v454_v0  }
  0x7c   : > { %1922 = vset.pattern.permute.xlu1 %v1981_v2 }
  0x7d   : > { %589 = vperm.xlu1 %1922, %v550_v1  }
  0x81   : > { %1923 = vset.pattern.permute.xlu1 %v1983_v6 }
  0x82   : > { %416 = vperm.xlu1 %1923, %v373_v49  }
  0x86   : > { %1924 = vset.pattern.permute.xlu1 %v1982_v3 }
  0x87   : > { %496 = vperm.xlu1 %1924, %v455_v4  }
  0x8b   : > { %499 = vperm.xlu1 %1924, %v456_v5  }
  0x8f   : > { %1926 = vset.pattern.permute.xlu1 %v1981_v2 }
  0x90   : > { %595 = vperm.xlu1 %1926, %v552_v7  }
  0x94   : > { %1927 = vset.pattern.permute.xlu1 %v1983_v6  ;;  %v461_v8 = vpop.permute.xlu1 %460  ;;  %v557_v9 = vpop.permute.xlu0 %556 }
  0x95   : > { %422 = vperm.xlu1 %1927, %v375_v58   ;;  %vm507_vm3 = vcmp.eq.s32.totalorder %v2161_v17, %v461_v8  ;;  %vm603_vm5 = vcmp.eq.s32.totalorder %v2161_v17, %v557_v9 }
  0x98   : > { %v464_v11 = vpop.permute.xlu1 %463  ;;  %v563_v12 = vpop.permute.xlu0 %562 }
  0x99   : > { %1928 = vset.pattern.permute.xlu1 %v1982_v3  ;;  %vm508_vm7 = vcmp.eq.s32.totalorder %v2161_v17, %v464_v11  ;;  %vm605_vm0 = vcmp.eq.s32.totalorder %v2161_v17, %v563_v12 }
  0x9a   : > { %502 = vperm.xlu1 %1928, %v457_v10  }
  0x9c   : > { %v2158_v15 = vpop.permute.xlu0 %568 }
  0x9d   : > { %v560_v16 = vpop.permute.xlu1 %559 }
  0x9e   : > { %505 = vperm.xlu1 %1928, %v458_v14   ;;  %vm604_vm10 = vcmp.eq.s32.totalorder %v2161_v17, %v560_v16  ;;  %v1960_v14 = vld [vmem:[%s2424_s5 + $0x28] sm:$0xff]  }
  0xa1   : > { %v381_v19 = vpop.permute.xlu0 %380 }
  0xa2   : > { %vm427_vm4 = vcmp.eq.s32.totalorder %v2161_v17, %v381_v19  ;;  %1930 = vset.pattern.permute.xlu1 %v1981_v2  ;;  %v387_v20 = vpop.permute.xlu1 %386  ;;  %v1949_v2 = vld [vmem:[%s2424_s5 + $0x40] sm:$0xff]   ;;  %v1961_v19 = vld [vmem:[%s2424_s5 + $0x70] sm:$0xff]  }
  0xa3   : > { %vm523_vm6 = vmor %vm427_vm4, %vm507_vm3  ;;  %601 = vperm.xlu1 %1930, %v554_v18   ;;  %1747 = vmatprep.subr.bf16.mxu1 %v1949_v2  ;;  %vm429_vm15 = vcmp.eq.s32.totalorder %v2161_v17, %v387_v20  ;;  %v1964_v2 = vld [vmem:[%s2424_s5 + $0x38] sm:$0xff]  }
  0xa4   : > { %vm619_vm8 = vmor %vm523_vm6, %vm603_vm5  ;;  %1748 = vmatpush3.bf16.msra.mxu1 %v1950_v22 }
  0xa5   : > { %v384_v3 = vpop.permute.xlu0 %383  ;;  %v1669_v24 = vsel %vm619_vm8, 1.0, %v1984_v23  ;;  %1749 = vmatprep.subr.bf16.mxu1 %v1951_v26 }
  0xa6   : > { %vm428_vm9 = vcmp.eq.s32.totalorder %v2161_v17, %v384_v3  ;;  %v1962_v3 = vld [vmem:[%s2424_s5 + $0x30] sm:$0xff]  }
  0xa7   : > { %vm524_vm11 = vmor %vm428_vm9, %vm508_vm7  ;;  %v467_v21 = vpop.permute.xlu1 %466 }
  0xa8   : > { %vm620_vm12 = vmor %vm524_vm11, %vm604_vm10  ;;  %vm509_vm14 = vcmp.eq.s32.totalorder %v2161_v17, %v467_v21  ;;  %1750 = vmatpush3.bf16.msra.mxu1 %v1952_v30  ;;  %vm607_vm10 = vcmp.eq.s32.totalorder %v2161_v17, %v2158_v15  ;;  %v1963_v21 = vld [vmem:[%s2424_s5 + $0x78] sm:$0xff]  }
  0xa9   : > { %v1670_v25 = vsel %vm620_vm12, 1.0, %v1984_v23  ;;  %v390_v28 = vpop.permute.xlu0 %389  ;;  %vm525_vm1 = vmor %vm429_vm15, %vm509_vm14  ;;  %1751 = vmatprep.subr.bf16.mxu1 %v1953_v31 }
  0xaa   : > { %v667_v27 = vpack.c.bf16 %v1670_v25, %v1669_v24  ;;  %vm430_vm2 = vcmp.eq.s32.totalorder %v2161_v17, %v390_v28  ;;  %vm621_vm4 = vmor %vm525_vm1, %vm605_vm0 }
  0xab   : > { %v470_v29 = vpop.permute.xlu1 %469  ;;  %v1671_v35 = vsel %vm621_vm4, 1.0, %v1984_v23 }
  0xac   : > { %1711 = vmatmul.mubr.msk.bf16.vlgmr.msra.gmra.mrb[0].mxu0 %vm912_vm13, %v667_v27  ;;  %vm510_vm3 = vcmp.eq.s32.totalorder %v2161_v17, %v470_v29  ;;  %1752 = vmatpush3.bf16.msra.mxu1 %v1954_v32 }
  0xad   : > { %986 = vmatprep.mubr.bf16.mxu0 %v1983_v6  ;;  %vm526_vm5 = vmor %vm430_vm2, %vm510_vm3  ;;  %1753 = vmatprep.subr.bf16.mxu1 %v1955_v34  ;;  %v396_v42 = vpop.permute.xlu0 %395 }
  0xae   : > { %vm432_vm12 = vcmp.eq.s32.totalorder %v2161_v17, %v396_v42 }
  0xb0   : > { %v566_v33 = vpop.permute.xlu1 %565  ;;  %1754 = vmatpush3.bf16.msra.mxu1 %v1956_v37 }
  0xb1   : > { %vm606_vm6 = vcmp.eq.s32.totalorder %v2161_v17, %v566_v33  ;;  %1755 = vmatprep.subr.bf16.mxu1 %v1957_v39  ;;  %v402_v46 = vpop.permute.xlu0 %401  ;;  %v1060_v39 = vshrl.u32 %v377_v13, 7 }
  0xb2   : > { %vm622_vm7 = vmor %vm526_vm5, %vm606_vm6 }
  0xb3   : > { %v1672_v36 = vsel %vm622_vm7, 1.0, %v1984_v23  ;;  %vm434_vm7 = vcmp.eq.s32.totalorder %v2161_v17, %v402_v46  ;;  %v1065_v42 = vsub.s32 1, %v1060_v39 }
  0xb4   : > { %v668_v38 = vpack.c.bf16 %v1672_v36, %v1671_v35  ;;  %1756 = vmatpush3.bf16.msra.mxu1 %v1958_v41  ;;  %v1057_v41 = vld [vmem:[%s2423_s4] sm:$0x3] }
  0xb5   : > { %v393_v40 = vpop.permute.xlu1 %392  ;;  %1757 = vmatprep.subr.bf16.mxu1 %v1959_v43  ;;  %v408_v48 = vpop.permute.xlu0 %407 }
  0xb6   : > { %1712 = vmatmul.mubr.msk.bf16.gmra.mrb[4].mxu0 %vm912_vm13, %v668_v38  ;;  %vm431_vm9 = vcmp.eq.s32.totalorder %v2161_v17, %v393_v40  ;;  %v1061_v40 = vsub.s32 0, %v1060_v39 }
  0xb7   : > { %996 = vmatprep.mubr.bf16.mxu0 %v1983_v6 }
  0xb8   : > { %1758 = vmatpush3.bf16.msra.mxu1 %v1960_v14  ;;  %v2296_v43 = vrot.slane %v1057_v41, %v1061_v40 }
  0xb9   : > { %v414_v53 = vpop.permute.xlu0 %413  ;;  %1759 = vmatprep.subr.bf16.mxu1 %v1961_v19 }
  0xba   : > { %v473_v44 = vpop.permute.xlu1 %472 }
  0xbb   : > { %vm511_vm8 = vcmp.eq.s32.totalorder %v2161_v17, %v473_v44  ;;  %v2298_v44 = vrot.slane %v1057_v41, %v1065_v42 }
  0xbc   : > { %vm527_vm11 = vmor %vm431_vm9, %vm511_vm8  ;;  %1760 = vmatpush3.bf16.msra.mxu1 %v1962_v3 }
  0xbd   : > { %vm623_vm15 = vmor %vm527_vm11, %vm607_vm10  ;;  %1761 = vmatprep.subr.bf16.mxu1 %v1963_v21 }
  0xbe   : > { %v476_v45 = vpop.permute.xlu1 %475  ;;  %v1673_v49 = vsel %vm623_vm15, 1.0, %v1984_v23  ;;  %v575_v55 = vpop.permute.xlu0 %574 }
  0xbf   : > { %vm512_vm14 = vcmp.eq.s32.totalorder %v2161_v17, %v476_v45  ;;  %vm609_vm6 = vcmp.eq.s32.totalorder %v2161_v17, %v575_v55  ;;  %v1965_v55 = vld [vmem:[%s2426_s7] sm:$0xff]  }
  0xc0   : > { %vm528_vm0 = vmor %vm432_vm12, %vm512_vm14  ;;  %1762 = vmatpush3.bf16.msra.mxu1 %v1964_v2 }
  0xc1   : > { %1827 = vmatprep.subr.bf16.mxu1 %v1965_v55 }
  0xc2   : > { %v581_v63 = vpop.permute.xlu0 %580 }
  0xc3   : > { %v572_v47 = vpop.permute.xlu1 %571 }
  0xc4   : > { %vm608_vm1 = vcmp.eq.s32.totalorder %v2161_v17, %v572_v47 }
  0xc5   : > { %vm624_vm2 = vmor %vm528_vm0, %vm608_vm1  ;;  %vm611_vm1 = vcmp.eq.s32.totalorder %v2161_v17, %v581_v63 }
  0xc6   : > { %v1674_v50 = vsel %vm624_vm2, 1.0, %v1984_v23  ;;  %vm436_vm2 = vcmp.eq.s32.totalorder %v2161_v17, %v408_v48  ;;  %v587_v10 = vpop.permute.xlu0 %586 }
  0xc7   : > { %v669_v51 = vpack.c.bf16 %v1674_v50, %v1673_v49 }
  0xc8   : > { %v399_v52 = vpop.permute.xlu1 %398 }
  0xc9   : > { %1713 = vmatmul.mubr.msk.bf16.gmra.mrb[8].mxu0 %vm912_vm13, %v669_v51  ;;  %vm433_vm4 = vcmp.eq.s32.totalorder %v2161_v17, %v399_v52 }
  0xca   : > { %1006 = vmatprep.mubr.bf16.mxu0 %v1983_v6  ;;  %v593_v22 = vpop.permute.xlu0 %592 }
  0xcd   : > { %v479_v54 = vpop.permute.xlu1 %478 }
  0xce   : > { %vm513_vm3 = vcmp.eq.s32.totalorder %v2161_v17, %v479_v54 }
  0xcf   : > { %vm529_vm5 = vmor %vm433_vm4, %vm513_vm3  ;;  %v420_v25 = vpop.permute.xlu0 %419 }
  0xd0   : > { %vm625_vm9 = vmor %vm529_vm5, %vm609_vm6 }
  0xd1   : > { %v482_v56 = vpop.permute.xlu1 %481  ;;  %v1675_v58 = vsel %vm625_vm9, 1.0, %v1984_v23 }
  0xd2   : > { %vm514_vm8 = vcmp.eq.s32.totalorder %v2161_v17, %v482_v56 }
  0xd3   : > { %vm530_vm10 = vmor %vm434_vm7, %vm514_vm8  ;;  %v426_v32 = vpop.permute.xlu0 %425 }
  0xd6   : > { %v578_v57 = vpop.permute.xlu1 %577 }
  0xd7   : > { %vm610_vm11 = vcmp.eq.s32.totalorder %v2161_v17, %v578_v57  ;;  %v1966_v57 = vld [vmem:[%s2426_s7 + $0x8] sm:$0xff]  }
  0xd8   : > { %vm626_vm12 = vmor %vm530_vm10, %vm610_vm11  ;;  %vm613_vm11 = vcmp.eq.s32.totalorder %v2161_v17, %v587_v10  ;;  %v599_v34 = vpop.permute.xlu0 %598 }
  0xd9   : > { %v1676_v59 = vsel %vm626_vm12, 1.0, %v1984_v23 }
  0xda   : > { %v670_v60 = vpack.c.bf16 %v1676_v59, %v1675_v58 }
  0xdb   : > { %v405_v61 = vpop.permute.xlu1 %404 }
  0xdc   : > { %1714 = vmatmul.mubr.msk.bf16.gmra.mrb[12].mxu0 %vm912_vm13, %v670_v60  ;;  %vm435_vm15 = vcmp.eq.s32.totalorder %v2161_v17, %v405_v61 }
  0xdd   : > { %1016 = vmatprep.mubr.bf16.mxu0 %v1983_v6 }
  0xe0   : > { %v485_v62 = vpop.permute.xlu1 %484 }
  0xe1   : > { %vm515_vm14 = vcmp.eq.s32.totalorder %v2161_v17, %v485_v62 }
  0xe2   : > { %vm531_vm0 = vmor %vm435_vm15, %vm515_vm14  ;;  %vm438_vm14 = vcmp.eq.s32.totalorder %v2161_v17, %v414_v53 }
  0xe3   : > { %vm627_vm4 = vmor %vm531_vm0, %vm611_vm1 }
  0xe4   : > { %v488_v0 = vpop.permute.xlu1 %487  ;;  %v1677_v4 = vsel %vm627_vm4, 1.0, %v1984_v23 }
  0xe5   : > { %vm516_vm3 = vcmp.eq.s32.totalorder %v2161_v17, %v488_v0 }
  0xe6   : > { %vm532_vm5 = vmor %vm436_vm2, %vm516_vm3 }
  0xe9   : > { %v584_v1 = vpop.permute.xlu1 %583 }
  0xea   : > { %vm612_vm6 = vcmp.eq.s32.totalorder %v2161_v17, %v584_v1  ;;  %v1967_v1 = vld [vmem:[%s2426_s7 + $0x10] sm:$0xff]  }
  0xeb   : > { %vm628_vm7 = vmor %vm532_vm5, %vm612_vm6  ;;  %vm440_vm6 = vcmp.eq.s32.totalorder %v2161_v17, %v420_v25 }
  0xec   : > { %v1678_v5 = vsel %vm628_vm7, 1.0, %v1984_v23 }
  0xed   : > { %v671_v7 = vpack.c.bf16 %v1678_v5, %v1677_v4 }
  0xee   : > { %v411_v8 = vpop.permute.xlu1 %410 }
  0xef   : > { %1715 = vmatmul.mubr.msk.bf16.gmra.mrb[16].mxu0 %vm912_vm13, %v671_v7  ;;  %vm437_vm9 = vcmp.eq.s32.totalorder %v2161_v17, %v411_v8 }
  0xf0   : > { %1026 = vmatprep.mubr.bf16.mxu0 %v1983_v6 }
  0xf3   : > { %v491_v9 = vpop.permute.xlu1 %490 }
  0xf4   : > { %vm517_vm8 = vcmp.eq.s32.totalorder %v2161_v17, %v491_v9 }
  0xf5   : > { %vm533_vm10 = vmor %vm437_vm9, %vm517_vm8  ;;  %vm615_vm8 = vcmp.eq.s32.totalorder %v2161_v17, %v593_v22 }
  0xf6   : > { %vm629_vm15 = vmor %vm533_vm10, %vm613_vm11 }
  0xf7   : > { %v494_v11 = vpop.permute.xlu1 %493  ;;  %v1679_v15 = vsel %vm629_vm15, 1.0, %v1984_v23 }
  0xf8   : > { %vm518_vm12 = vcmp.eq.s32.totalorder %v2161_v17, %v494_v11 }
  0xf9   : > { %vm534_vm0 = vmor %vm438_vm14, %vm518_vm12 }
  0xfc   : > { %v590_v12 = vpop.permute.xlu1 %589 }
  0xfd   : > { %vm614_vm1 = vcmp.eq.s32.totalorder %v2161_v17, %v590_v12 }
  0xfe   : > { %vm630_vm2 = vmor %vm534_vm0, %vm614_vm1  ;;  %vm617_vm1 = vcmp.eq.s32.totalorder %v2161_v17, %v599_v34 }
  0xff   : > { %v1680_v16 = vsel %vm630_vm2, 1.0, %v1984_v23 }
 0x100   : > { %v672_v18 = vpack.c.bf16 %v1680_v16, %v1679_v15 }
 0x101   : > { %v417_v20 = vpop.permute.xlu1 %416 }
 0x102   : > { %1716 = vmatmul.mubr.msk.bf16.gmra.mrb[20].mxu0 %vm912_vm13, %v672_v18  ;;  %vm439_vm4 = vcmp.eq.s32.totalorder %v2161_v17, %v417_v20 }
 0x103   : > { %1036 = vmatprep.mubr.bf16.mxu0 %v1983_v6 }
 0x106   : > { %v497_v24 = vpop.permute.xlu1 %496 }
 0x107   : > { %vm519_vm3 = vcmp.eq.s32.totalorder %v2161_v17, %v497_v24 }
 0x108   : > { %vm535_vm5 = vmor %vm439_vm4, %vm519_vm3  ;;  %vm442_vm3 = vcmp.eq.s32.totalorder %v2161_v17, %v426_v32 }
 0x109   : > { %vm631_vm9 = vmor %vm535_vm5, %vm615_vm8 }
 0x10a   : > { %v500_v26 = vpop.permute.xlu1 %499  ;;  %v1681_v28 = vsel %vm631_vm9, 1.0, %v1984_v23 }
 0x10b   : > { %vm520_vm7 = vcmp.eq.s32.totalorder %v2161_v17, %v500_v26 }
 0x10c   : > { %vm536_vm10 = vmor %vm440_vm6, %vm520_vm7 }
 0x10f   : > { %v596_v27 = vpop.permute.xlu1 %595 }
 0x110   : > { %vm616_vm11 = vcmp.eq.s32.totalorder %v2161_v17, %v596_v27 }
 0x111   : > { %vm632_vm12 = vmor %vm536_vm10, %vm616_vm11 }
 0x112   : > { %v1682_v29 = vsel %vm632_vm12, 1.0, %v1984_v23 }
 0x113   : > { %v673_v30 = vpack.c.bf16 %v1682_v29, %v1681_v28 }
 0x114   : > { %v423_v31 = vpop.permute.xlu1 %422 }
 0x115   : > { %1717 = vmatmul.mubr.msk.bf16.gmra.mrb[24].mxu0 %vm912_vm13, %v673_v30  ;;  %vm441_vm15 = vcmp.eq.s32.totalorder %v2161_v17, %v423_v31 }
 0x116   : > { %1046 = vmatprep.mubr.bf16.mxu0 %v1983_v6 }
 0x119   : > { %v503_v33 = vpop.permute.xlu1 %502 }
 0x11a   : > { %vm521_vm14 = vcmp.eq.s32.totalorder %v2161_v17, %v503_v33 }
 0x11b   : > { %vm537_vm0 = vmor %vm441_vm15, %vm521_vm14 }
 0x11c   : > { %vm633_vm4 = vmor %vm537_vm0, %vm617_vm1 }
 0x11d   : > { %v506_v35 = vpop.permute.xlu1 %505  ;;  %v1683_v6 = vsel %vm633_vm4, 1.0, %v1984_v23 }
 0x11e   : > { %vm522_vm2 = vcmp.eq.s32.totalorder %v2161_v17, %v506_v35 }
 0x11f   : > { %vm538_vm5 = vmor %vm442_vm3, %vm522_vm2 }
 0x122   : > { %v602_v36 = vpop.permute.xlu1 %601 }
 0x123   : > { %vm618_vm6 = vcmp.eq.s32.totalorder %v2161_v17, %v602_v36 }
 0x124   : > { %vm634_vm7 = vmor %vm538_vm5, %vm618_vm6 }
 0x125   : > { %v1684_v37 = vsel %vm634_vm7, 1.0, %v1984_v23 }
 0x126   : > { %v674_v38 = vpack.c.bf16 %v1684_v37, %v1683_v6 }
 0x128   : > { %1718 = vmatmul.mubr.msk.bf16.gmra.mrb[28].mxu0 %vm912_vm13, %v674_v38  ;;  %vm1573_vm13 = vcmask 7168  }
 0x17f   : > { %v978_v17 = vpop.f32.mrb[0].mxu0 }
 0x180   : > { %v1069_v45 = vadd.f32 %v2296_v43, %v978_v17  ;;  %v980_v46 = vpop.f32.mrb[1].mxu0 }
 0x181   : > { %v1070_v23 = vadd.f32 %v2298_v44, %v980_v46  ;;  %v982_v47 = vpop.f32.mrb[2].mxu0 }
 0x182   : > { %v1071_v48 = vadd.f32 %v2296_v43, %v982_v47  ;;  %v984_v13 = vpop.f32.mrb[3].mxu0  ;;  %v1101_v50 = vmax.f32 %v1069_v45, 0.0 }
 0x183   : > { %v1072_v49 = vadd.f32 %v2298_v44, %v984_v13  ;;  %v1102_v52 = vmax.f32 %v1070_v23, 0.0 }
 0x184   : > { %v1103_v51 = vmax.f32 %v1071_v48, 0.0 }
 0x185   : > { %v1104_v53 = vmax.f32 %v1072_v49, 0.0 }
 0x186   : > { %v1133_v54 = vpack.c.bf16 %v1103_v51, %v1101_v50 }
 0x187   : > { %v1134_v56 = vpack.c.bf16 %v1104_v53, %v1102_v52 }
 0x189   : > { %v988_v58 = vpop.f32.mrb[4].mxu0  ;;  %1316 = vmatprep.mubr.bf16.mxu1 %v1134_v56 }
 0x18a   : > { %v1073_v59 = vadd.f32 %v2296_v43, %v988_v58  ;;  %v990_v60 = vpop.f32.mrb[5].mxu0  ;;  %1317 = vmatmul.mubr.bf16.vlgmr.msra.gmra.mrb[0].mxu1 %v1133_v54 }
 0x18b   : > { %v1074_v61 = vadd.f32 %v2298_v44, %v990_v60  ;;  %v992_v62 = vpop.f32.mrb[6].mxu0  ;;  %1828 = vmatpush3.bf16.msra.mxu1 %v1965_v55 }
 0x18c   : > { %v1075_v63 = vadd.f32 %v2296_v43, %v992_v62  ;;  %v994_v0 = vpop.f32.mrb[7].mxu0  ;;  %1829 = vmatprep.subr.bf16.mxu1 %v1966_v57  ;;  %v1105_v5 = vmax.f32 %v1073_v59, 0.0 }
 0x18d   : > { %v1076_v4 = vadd.f32 %v2298_v44, %v994_v0  ;;  %v1106_v8 = vmax.f32 %v1074_v61, 0.0 }
 0x18e   : > { %v1107_v7 = vmax.f32 %v1075_v63, 0.0 }
 0x18f   : > { %v1108_v9 = vmax.f32 %v1076_v4, 0.0  ;;  %1830 = vmatpush3.bf16.msra.mxu1 %v1966_v57 }
 0x190   : > { %v1135_v10 = vpack.c.bf16 %v1107_v7, %v1105_v5  ;;  %1831 = vmatprep.subr.bf16.mxu1 %v1967_v1  ;;  %v1968_v5 = vld [vmem:[%s2426_s7 + $0x18] sm:$0xff]   ;;  %v1969_v7 = vld [vmem:[%s2426_s7 + $0x20] sm:$0xff]  }
 0x191   : > { %v1136_v11 = vpack.c.bf16 %v1108_v9, %v1106_v8  ;;  %v1970_v8 = vld [vmem:[%s2426_s7 + $0x28] sm:$0xff]  }
 0x193   : > { %1324 = vmatprep.mubr.bf16.mxu1 %v1136_v11  ;;  %1832 = vmatpush3.bf16.msra.mxu1 %v1967_v1 }
 0x194   : > { %1325 = vmatmul.mubr.bf16.gmra.mrb[4].mxu1 %v1135_v10  ;;  %1833 = vmatprep.subr.bf16.mxu1 %v1968_v5 }
 0x197   : > { %1834 = vmatpush3.bf16.msra.mxu1 %v1968_v5 }
 0x198   : > { %1835 = vmatprep.subr.bf16.mxu1 %v1969_v7 }
 0x19b   : > { %1836 = vmatpush3.bf16.msra.mxu1 %v1969_v7 }
 0x19c   : > { %v998_v12 = vpop.f32.mrb[8].mxu0  ;;  %1837 = vmatprep.subr.bf16.mxu1 %v1970_v8 }
 0x19d   : > { %v1077_v14 = vadd.f32 %v2296_v43, %v998_v12  ;;  %v1000_v15 = vpop.f32.mrb[9].mxu0  ;;  %v1971_v12 = vld [vmem:[%s2426_s7 + $0x30] sm:$0xff]  }
 0x19e   : > { %v1078_v16 = vadd.f32 %v2298_v44, %v1000_v15  ;;  %v1002_v18 = vpop.f32.mrb[10].mxu0 }
 0x19f   : > { %v1079_v19 = vadd.f32 %v2296_v43, %v1002_v18  ;;  %v1004_v20 = vpop.f32.mrb[11].mxu0  ;;  %v1109_v21 = vmax.f32 %v1077_v14, 0.0  ;;  %1838 = vmatpush3.bf16.msra.mxu1 %v1970_v8 }
 0x1a0   : > { %v1080_v3 = vadd.f32 %v2298_v44, %v1004_v20  ;;  %v1110_v22 = vmax.f32 %v1078_v16, 0.0  ;;  %1839 = vmatprep.subr.bf16.mxu1 %v1971_v12 }
 0x1a1   : > { %v1111_v2 = vmax.f32 %v1079_v19, 0.0 }
 0x1a2   : > { %v1112_v24 = vmax.f32 %v1080_v3, 0.0 }
 0x1a3   : > { %v1137_v25 = vpack.c.bf16 %v1111_v2, %v1109_v21  ;;  %1840 = vmatpush3.bf16.msra.mxu1 %v1971_v12  ;;  %v1972_v21 = vld [vmem:[%s2426_s7 + $0x38] sm:$0xff]  }
 0x1a4   : > { %v1138_v26 = vpack.c.bf16 %v1112_v24, %v1110_v22  ;;  %1841 = vmatprep.subr.bf16.mxu1 %v1972_v21 }
 0x1a6   : > { %1332 = vmatprep.mubr.bf16.mxu1 %v1138_v26 }
 0x1a7   : > { %1333 = vmatmul.mubr.bf16.gmra.mrb[8].mxu1 %v1137_v25 }
 0x1a8   : > { %1842 = vmatpush3.bf16.msra.mxu1 %v1972_v21 }
 0x1af   : > { %v1008_v27 = vpop.f32.mrb[12].mxu0 }
 0x1b0   : > { %v1081_v28 = vadd.f32 %v2296_v43, %v1008_v27  ;;  %v1010_v29 = vpop.f32.mrb[13].mxu0 }
 0x1b1   : > { %v1082_v30 = vadd.f32 %v2298_v44, %v1010_v29  ;;  %v1012_v31 = vpop.f32.mrb[14].mxu0 }
 0x1b2   : > { %v1083_v32 = vadd.f32 %v2296_v43, %v1012_v31  ;;  %v1014_v33 = vpop.f32.mrb[15].mxu0  ;;  %v1113_v35 = vmax.f32 %v1081_v28, 0.0 }
 0x1b3   : > { %v1084_v34 = vadd.f32 %v2298_v44, %v1014_v33  ;;  %v1114_v6 = vmax.f32 %v1082_v30, 0.0 }
 0x1b4   : > { %v1115_v36 = vmax.f32 %v1083_v32, 0.0 }
 0x1b5   : > { %v1116_v37 = vmax.f32 %v1084_v34, 0.0 }
 0x1b6   : > { %v1139_v38 = vpack.c.bf16 %v1115_v36, %v1113_v35 }
 0x1b7   : > { %v1140_v39 = vpack.c.bf16 %v1116_v37, %v1114_v6 }
 0x1b9   : > { %1340 = vmatprep.mubr.bf16.mxu1 %v1140_v39 }
 0x1ba   : > { %1341 = vmatmul.mubr.bf16.gmra.mrb[12].mxu1 %v1139_v38 }
 0x1c2   : > { %v1018_v40 = vpop.f32.mrb[16].mxu0 }
 0x1c3   : > { %v1085_v41 = vadd.f32 %v2296_v43, %v1018_v40  ;;  %v1020_v42 = vpop.f32.mrb[17].mxu0  ;;  %v2359_v40 = vld [vmem:[%s2425_s6] ss:$0 sm:$0xff] }
 0x1c4   : > { %v1086_v17 = vadd.f32 %v2298_v44, %v1020_v42  ;;  %v1022_v45 = vpop.f32.mrb[18].mxu0 }
 0x1c5   : > { %v1087_v46 = vadd.f32 %v2296_v43, %v1022_v45  ;;  %v1024_v23 = vpop.f32.mrb[19].mxu0  ;;  %v1117_v48 = vmax.f32 %v1085_v41, 0.0 }
 0x1c6   : > { %v1088_v47 = vadd.f32 %v2298_v44, %v1024_v23  ;;  %v1118_v49 = vmax.f32 %v1086_v17, 0.0 }
 0x1c7   : > { %v1119_v13 = vmax.f32 %v1087_v46, 0.0 }
 0x1c8   : > { %v1120_v50 = vmax.f32 %v1088_v47, 0.0 }
 0x1c9   : > { %v1141_v51 = vpack.c.bf16 %v1119_v13, %v1117_v48 }
 0x1ca   : > { %v1142_v52 = vpack.c.bf16 %v1120_v50, %v1118_v49 }
 0x1cc   : > { %1348 = vmatprep.mubr.bf16.mxu1 %v1142_v52 }
 0x1cd   : > { %1349 = vmatmul.mubr.bf16.gmra.mrb[16].mxu1 %v1141_v51 }
 0x1d5   : > { %v1028_v53 = vpop.f32.mrb[20].mxu0 }
 0x1d6   : > { %v1089_v54 = vadd.f32 %v2296_v43, %v1028_v53  ;;  %v1030_v55 = vpop.f32.mrb[21].mxu0 }
 0x1d7   : > { %v1090_v56 = vadd.f32 %v2298_v44, %v1030_v55  ;;  %v1032_v57 = vpop.f32.mrb[22].mxu0 }
 0x1d8   : > { %v1091_v58 = vadd.f32 %v2296_v43, %v1032_v57  ;;  %v1034_v59 = vpop.f32.mrb[23].mxu0  ;;  %v1121_v61 = vmax.f32 %v1089_v54, 0.0 }
 0x1d9   : > { %v1092_v60 = vadd.f32 %v2298_v44, %v1034_v59  ;;  %v1122_v63 = vmax.f32 %v1090_v56, 0.0 }
 0x1da   : > { %v1123_v62 = vmax.f32 %v1091_v58, 0.0 }
 0x1db   : > { %v1124_v0 = vmax.f32 %v1092_v60, 0.0 }
 0x1dc   : > { %v1143_v1 = vpack.c.bf16 %v1123_v62, %v1121_v61 }
 0x1dd   : > { %v1144_v4 = vpack.c.bf16 %v1124_v0, %v1122_v63 }
 0x1df   : > { %1356 = vmatprep.mubr.bf16.mxu1 %v1144_v4 }
 0x1e0   : > { %1357 = vmatmul.mubr.bf16.gmra.mrb[20].mxu1 %v1143_v1 }
 0x1e8   : > { %v1038_v9 = vpop.f32.mrb[24].mxu0 }
 0x1e9   : > { %v1093_v10 = vadd.f32 %v2296_v43, %v1038_v9  ;;  %v1040_v11 = vpop.f32.mrb[25].mxu0 }
 0x1ea   : > { %v1094_v14 = vadd.f32 %v2298_v44, %v1040_v11  ;;  %v1042_v15 = vpop.f32.mrb[26].mxu0 }
 0x1eb   : > { %v1095_v16 = vadd.f32 %v2296_v43, %v1042_v15  ;;  %v1044_v18 = vpop.f32.mrb[27].mxu0  ;;  %v1125_v20 = vmax.f32 %v1093_v10, 0.0 }
 0x1ec   : > { %v1096_v19 = vadd.f32 %v2298_v44, %v1044_v18  ;;  %v1126_v2 = vmax.f32 %v1094_v14, 0.0 }
 0x1ed   : > { %v1127_v3 = vmax.f32 %v1095_v16, 0.0 }
 0x1ee   : > { %v1128_v22 = vmax.f32 %v1096_v19, 0.0 }
 0x1ef   : > { %v1145_v24 = vpack.c.bf16 %v1127_v3, %v1125_v20 }
 0x1f0   : > { %v1146_v25 = vpack.c.bf16 %v1128_v22, %v1126_v2 }
 0x1f2   : > { %1364 = vmatprep.mubr.bf16.mxu1 %v1146_v25 }
 0x1f3   : > { %1365 = vmatmul.mubr.bf16.gmra.mrb[24].mxu1 %v1145_v24 }
 0x1fb   : > { %v1048_v26 = vpop.f32.mrb[28].mxu0 }
 0x1fc   : > { %v1097_v27 = vadd.f32 %v2296_v43, %v1048_v26  ;;  %v1050_v28 = vpop.f32.mrb[29].mxu0 }
 0x1fd   : > { %v1098_v29 = vadd.f32 %v2298_v44, %v1050_v28  ;;  %v1052_v30 = vpop.f32.mrb[30].mxu0 }
 0x1fe   : > { %v1099_v31 = vadd.f32 %v2296_v43, %v1052_v30  ;;  %v1054_v32 = vpop.f32.mrb[31].mxu0  ;;  %v1129_v34 = vmax.f32 %v1097_v27, 0.0 }
 0x1ff   : > { %v1100_v33 = vadd.f32 %v2298_v44, %v1054_v32  ;;  %v1130_v36 = vmax.f32 %v1098_v29, 0.0 }
 0x200   : > { %v1131_v35 = vmax.f32 %v1099_v31, 0.0 }
 0x201   : > { %v1132_v6 = vmax.f32 %v1100_v33, 0.0 }
 0x202   : > { %v1147_v37 = vpack.c.bf16 %v1131_v35, %v1129_v34 }
 0x203   : > { %v1148_v38 = vpack.c.bf16 %v1132_v6, %v1130_v36 }
 0x205   : > { %1372 = vmatprep.mubr.bf16.mxu1 %v1148_v38 }
 0x206   : > { %1373 = vmatmul.mubr.bf16.gmra.mrb[28].mxu1 %v1147_v37 }
 0x25d   : > { %v1763_v39 = vpop.f32.mrb[0].mxu1 }
 0x25e   : > { %v1764_v41 = vpop.f32.mrb[1].mxu1 }
 0x25f   : > { %v1765_v42 = vadd.f32 %v1764_v41, %v1763_v39  ;;  %v1766_v43 = vpop.f32.mrb[2].mxu1 }
 0x260   : > { %v1767_v17 = vpop.f32.mrb[3].mxu1 }
 0x261   : > { %v1319_v44 = vadd.f32 %v1765_v42, %v2359_v40  ;;  %v1768_v45 = vadd.f32 %v1767_v17, %v1766_v43 }
 0x263   : > { %v1322_v46 = vadd.f32 %v1768_v45, %v2359_v40  ;;  %v1381_v23 = vmax.f32 %v1319_v44, 0.0 }
 0x265   : > { %v1382_v47 = vmax.f32 %v1322_v46, 0.0 }
 0x267   : > { %v1769_v48 = vpop.f32.mrb[4].mxu1  ;;  %v1397_v13 = vpack.c.bf16 %v1382_v47, %v1381_v23 }
 0x268   : > { %v1770_v49 = vpop.f32.mrb[5].mxu1 }
 0x269   : > { %v1771_v50 = vadd.f32 %v1770_v49, %v1769_v48  ;;  %v1772_v51 = vpop.f32.mrb[6].mxu1  ;;  %1843 = vmatprep.mubr.bf16.mxu1 %v1397_v13 }
 0x26a   : > { %v1773_v52 = vpop.f32.mrb[7].mxu1 }
 0x26b   : > { %v1327_v53 = vadd.f32 %v1771_v50, %v2359_v40  ;;  %v1774_v54 = vadd.f32 %v1773_v52, %v1772_v51 }
 0x26d   : > { %v1330_v55 = vadd.f32 %v1774_v54, %v2359_v40  ;;  %v1383_v56 = vmax.f32 %v1327_v53, 0.0 }
 0x26f   : > { %v1384_v57 = vmax.f32 %v1330_v55, 0.0 }
 0x271   : > { %v1398_v58 = vpack.c.bf16 %v1384_v57, %v1383_v56 }
 0x273   : > { %1844 = vmatmul.mubr.bf16.vlgmr.msra.gmra.mrb[32].mxu1 %v1398_v58 }
 0x27a   : > { %v1775_v59 = vpop.f32.mrb[8].mxu1 }
 0x27b   : > { %v1776_v60 = vpop.f32.mrb[9].mxu1 }
 0x27c   : > { %v1777_v61 = vadd.f32 %v1776_v60, %v1775_v59  ;;  %v1778_v62 = vpop.f32.mrb[10].mxu1 }
 0x27d   : > { %v1779_v63 = vpop.f32.mrb[11].mxu1 }
 0x27e   : > { %v1335_v0 = vadd.f32 %v1777_v61, %v2359_v40  ;;  %v1780_v1 = vadd.f32 %v1779_v63, %v1778_v62  ;;  %v1736_v62 = vld [vmem:[#allocation2] ss:$0 sm:$0xff] }
 0x280   : > { %v1338_v4 = vadd.f32 %v1780_v1, %v2359_v40  ;;  %v1385_v5 = vmax.f32 %v1335_v0, 0.0 }
 0x282   : > { %v1386_v7 = vmax.f32 %v1338_v4, 0.0 }
 0x284   : > { %v1399_v8 = vpack.c.bf16 %v1386_v7, %v1385_v5 }
 0x286   : > { %1847 = vmatprep.mubr.bf16.mxu1 %v1399_v8 }
 0x28d   : > { %v1781_v9 = vpop.f32.mrb[12].mxu1 }
 0x28e   : > { %v1782_v10 = vpop.f32.mrb[13].mxu1 }
 0x28f   : > { %v1783_v11 = vadd.f32 %v1782_v10, %v1781_v9  ;;  %v1784_v12 = vpop.f32.mrb[14].mxu1 }
 0x290   : > { %v1785_v14 = vpop.f32.mrb[15].mxu1 }
 0x291   : > { %v1343_v15 = vadd.f32 %v1783_v11, %v2359_v40  ;;  %v1786_v16 = vadd.f32 %v1785_v14, %v1784_v12 }
 0x293   : > { %v1346_v18 = vadd.f32 %v1786_v16, %v2359_v40  ;;  %v1387_v19 = vmax.f32 %v1343_v15, 0.0 }
 0x295   : > { %v1388_v20 = vmax.f32 %v1346_v18, 0.0 }
 0x297   : > { %v1400_v3 = vpack.c.bf16 %v1388_v20, %v1387_v19 }
 0x299   : > { %1848 = vmatmul.mubr.bf16.gmra.mrb[36].mxu1 %v1400_v3 }
 0x2a0   : > { %v1787_v21 = vpop.f32.mrb[16].mxu1 }
 0x2a1   : > { %v1788_v2 = vpop.f32.mrb[17].mxu1 }
 0x2a2   : > { %v1789_v22 = vadd.f32 %v1788_v2, %v1787_v21  ;;  %v1790_v24 = vpop.f32.mrb[18].mxu1 }
 0x2a3   : > { %v1791_v25 = vpop.f32.mrb[19].mxu1 }
 0x2a4   : > { %v1351_v26 = vadd.f32 %v1789_v22, %v2359_v40  ;;  %v1792_v27 = vadd.f32 %v1791_v25, %v1790_v24 }
 0x2a6   : > { %v1354_v28 = vadd.f32 %v1792_v27, %v2359_v40  ;;  %v1389_v29 = vmax.f32 %v1351_v26, 0.0 }
 0x2a8   : > { %v1390_v30 = vmax.f32 %v1354_v28, 0.0 }
 0x2aa   : > { %v1401_v31 = vpack.c.bf16 %v1390_v30, %v1389_v29 }
 0x2ac   : > { %1851 = vmatprep.mubr.bf16.mxu1 %v1401_v31 }
 0x2b3   : > { %v1793_v32 = vpop.f32.mrb[20].mxu1 }
 0x2b4   : > { %v1794_v33 = vpop.f32.mrb[21].mxu1 }
 0x2b5   : > { %v1795_v34 = vadd.f32 %v1794_v33, %v1793_v32  ;;  %v1796_v35 = vpop.f32.mrb[22].mxu1 }
 0x2b6   : > { %v1797_v36 = vpop.f32.mrb[23].mxu1 }
 0x2b7   : > { %v1359_v6 = vadd.f32 %v1795_v34, %v2359_v40  ;;  %v1798_v37 = vadd.f32 %v1797_v36, %v1796_v35 }
 0x2b9   : > { %v1362_v38 = vadd.f32 %v1798_v37, %v2359_v40  ;;  %v1391_v39 = vmax.f32 %v1359_v6, 0.0 }
 0x2bb   : > { %v1392_v41 = vmax.f32 %v1362_v38, 0.0 }
 0x2bd   : > { %v1402_v42 = vpack.c.bf16 %v1392_v41, %v1391_v39 }
 0x2bf   : > { %1852 = vmatmul.mubr.bf16.gmra.mrb[40].mxu1 %v1402_v42 }
 0x2c6   : > { %v1799_v43 = vpop.f32.mrb[24].mxu1 }
 0x2c7   : > { %v1800_v17 = vpop.f32.mrb[25].mxu1 }
 0x2c8   : > { %v1801_v44 = vadd.f32 %v1800_v17, %v1799_v43  ;;  %v1802_v45 = vpop.f32.mrb[26].mxu1 }
 0x2c9   : > { %v1803_v46 = vpop.f32.mrb[27].mxu1 }
 0x2ca   : > { %v1367_v23 = vadd.f32 %v1801_v44, %v2359_v40  ;;  %v1804_v47 = vadd.f32 %v1803_v46, %v1802_v45 }
 0x2cc   : > { %v1370_v48 = vadd.f32 %v1804_v47, %v2359_v40  ;;  %v1393_v13 = vmax.f32 %v1367_v23, 0.0 }
 0x2ce   : > { %v1394_v49 = vmax.f32 %v1370_v48, 0.0 }
 0x2d0   : > { %v1403_v50 = vpack.c.bf16 %v1394_v49, %v1393_v13 }
 0x2d2   : > { %1855 = vmatprep.mubr.bf16.mxu1 %v1403_v50 }
 0x2d9   : > { %v1805_v51 = vpop.f32.mrb[28].mxu1 }
 0x2da   : > { %v1806_v52 = vpop.f32.mrb[29].mxu1 }
 0x2db   : > { %v1807_v53 = vadd.f32 %v1806_v52, %v1805_v51  ;;  %v1808_v54 = vpop.f32.mrb[30].mxu1 }
 0x2dc   : > { %v1809_v55 = vpop.f32.mrb[31].mxu1 }
 0x2dd   : > { %v1375_v56 = vadd.f32 %v1807_v53, %v2359_v40  ;;  %v1810_v57 = vadd.f32 %v1809_v55, %v1808_v54 }
 0x2df   : > { %v1378_v58 = vadd.f32 %v1810_v57, %v2359_v40  ;;  %v1395_v59 = vmax.f32 %v1375_v56, 0.0 }
 0x2e1   : > { %v1396_v60 = vmax.f32 %v1378_v58, 0.0 }
 0x2e3   : > { %v1404_v61 = vpack.c.bf16 %v1396_v60, %v1395_v59 }
 0x2e5   : > { %1856 = vmatmul.mubr.bf16.gmra.mrb[44].mxu1 %v1404_v61 }
 0x346   : > { %v1845_v63 = vpop.f32.mrb[32].mxu1 }
 0x347   : > { %v1519_v0 = vadd.f32 %v1845_v63, %v1736_v62  ;;  %v1510_v40 = vpop.f32.mrb[33].mxu1 }
 0x348   : > { %v1511_v1 = vadd.f32 %v1736_v62, %v1510_v40  ;;  %v1846_v4 = vpop.f32.mrb[34].mxu1 }
 0x349   : > { %1576 = vst.msk [vmem:[%s2382_s30 + $0x10] sm:$0xff] %vm1573_vm13, %v1519_v0  ;;  %v1522_v5 = vadd.f32 %v1846_v4, %v1736_v62  ;;  %v1513_v7 = vpop.f32.mrb[35].mxu1 }
 0x34a   : > { %1574 = vst.msk [vmem:[%s2382_s30] sm:$0xff] %vm1573_vm13, %v1511_v1  ;;  %v1514_v8 = vadd.f32 %v1736_v62, %v1513_v7 }
 0x34b   : > { %1577 = vst.msk [vmem:[%s2382_s30 + $0x18] sm:$0xff] %vm1573_vm13, %v1522_v5 }
 0x34c   : > { %1575 = vst.msk [vmem:[%s2382_s30 + $0x8] sm:$0xff] %vm1573_vm13, %v1514_v8 }
 0x36c   : > { %v1849_v9 = vpop.f32.mrb[36].mxu1 }
 0x36d   : > { %v1535_v10 = vadd.f32 %v1849_v9, %v1736_v62  ;;  %v1526_v11 = vpop.f32.mrb[37].mxu1 }
 0x36e   : > { %v1527_v12 = vadd.f32 %v1736_v62, %v1526_v11  ;;  %v1850_v14 = vpop.f32.mrb[38].mxu1 }
 0x36f   : > { %1580 = vst.msk [vmem:[%s2382_s30 + $0x30] sm:$0xff] %vm1573_vm13, %v1535_v10  ;;  %v1538_v15 = vadd.f32 %v1850_v14, %v1736_v62  ;;  %v1529_v16 = vpop.f32.mrb[39].mxu1 }
 0x370   : > { %1578 = vst.msk [vmem:[%s2382_s30 + $0x20] sm:$0xff] %vm1573_vm13, %v1527_v12  ;;  %v1530_v18 = vadd.f32 %v1736_v62, %v1529_v16 }
 0x371   : > { %1581 = vst.msk [vmem:[%s2382_s30 + $0x38] sm:$0xff] %vm1573_vm13, %v1538_v15 }
 0x372   : > { %1579 = vst.msk [vmem:[%s2382_s30 + $0x28] sm:$0xff] %vm1573_vm13, %v1530_v18 }
 0x392   : > { %v1853_v19 = vpop.f32.mrb[40].mxu1 }
 0x393   : > { %v1551_v20 = vadd.f32 %v1853_v19, %v1736_v62  ;;  %v1542_v3 = vpop.f32.mrb[41].mxu1 }
 0x394   : > { %v1543_v21 = vadd.f32 %v1736_v62, %v1542_v3  ;;  %v1854_v2 = vpop.f32.mrb[42].mxu1 }
 0x395   : > { %1584 = vst.msk [vmem:[%s2382_s30 + $0x50] sm:$0xff] %vm1573_vm13, %v1551_v20  ;;  %v1554_v22 = vadd.f32 %v1854_v2, %v1736_v62  ;;  %v1545_v24 = vpop.f32.mrb[43].mxu1 }
 0x396   : > { %1582 = vst.msk [vmem:[%s2382_s30 + $0x40] sm:$0xff] %vm1573_vm13, %v1543_v21  ;;  %v1546_v25 = vadd.f32 %v1736_v62, %v1545_v24 }
 0x397   : > { %1585 = vst.msk [vmem:[%s2382_s30 + $0x58] sm:$0xff] %vm1573_vm13, %v1554_v22 }
 0x398   : > { %1583 = vst.msk [vmem:[%s2382_s30 + $0x48] sm:$0xff] %vm1573_vm13, %v1546_v25 }
 0x3b8   : > { %v1857_v26 = vpop.f32.mrb[44].mxu1 }
 0x3b9   : > { %v1567_v27 = vadd.f32 %v1857_v26, %v1736_v62  ;;  %v1558_v28 = vpop.f32.mrb[45].mxu1 }
 0x3ba   : > { %v1559_v29 = vadd.f32 %v1736_v62, %v1558_v28  ;;  %v1858_v30 = vpop.f32.mrb[46].mxu1 }
 0x3bb   : > { %1588 = vst.msk [vmem:[%s2382_s30 + $0x70] sm:$0xff] %vm1573_vm13, %v1567_v27  ;;  %v1570_v31 = vadd.f32 %v1858_v30, %v1736_v62  ;;  %v1561_v32 = vpop.f32.mrb[47].mxu1 }
 0x3bc   : > { %1586 = vst.msk [vmem:[%s2382_s30 + $0x60] sm:$0xff] %vm1573_vm13, %v1559_v29  ;;  %v1562_v33 = vadd.f32 %v1736_v62, %v1561_v32 }
 0x3bd   : > { %1589 = vst.msk [vmem:[%s2382_s30 + $0x78] sm:$0xff] %vm1573_vm13, %v1570_v31 }
 0x3be   : > { %1587 = vst.msk [vmem:[%s2382_s30 + $0x68] sm:$0xff] %vm1573_vm13, %v1562_v33 }
 0x3bf PF: > { %s21_s11 = sadd.s32 1, %s1979_s11  }
 0x3c0   : > { %p18_p4 = scmp.ge.s32.totalorder %s21_s11, 4  }
 0x3c2   :  { %20 = sbr.rel (!%p18_p4) target bundleno = 3 (0x3), region = 89 }

</bundles_post_ra>
